<compile_context>
chip_gen: v7x
topology: tpu7x:2x2x1
jax: 0.10.0
libtpu: 0.0.40
codegen_flags: <defaults>
</compile_context>

<pallas_src>
import functools

import jax
import jax.numpy as jnp
from jax.experimental import pallas as pl
from jax.experimental.pallas import tpu as pltpu


def res_block_kernel(x_ref, w1_ref, b1_ref, wa_ref, wb_ref, w2_ref, b2_ref,
                     o_ref):
    # FC1: Linear + bias (no nonlinearity).  x arrives f32 at its real width;
    # one bf16 cast feeds the MXU, accumulation stays f32.
    x = x_ref[...].astype(jnp.bfloat16)                          # (bn, d_in)
    x1 = jnp.dot(x, w1_ref[...],
                 preferred_element_type=jnp.float32) + b1_ref[...]  # (bn, h_p) f32

    # Residual sub-block m(x) = Linear -> ReLU -> Linear (bias=False).
    x1_bf = x1.astype(jnp.bfloat16)                              # single reused cast
    h1 = jnp.maximum(
        jnp.dot(x1_bf, wa_ref[...], preferred_element_type=jnp.float32), 0.0)
    m_out = jnp.dot(h1.astype(jnp.bfloat16), wb_ref[...],
                    preferred_element_type=jnp.float32)

    # x = nl(m(x) + x) : fused residual add + ReLU, then one cast for FC2.
    x2 = jnp.maximum(m_out + x1, 0.0).astype(jnp.bfloat16)

    # FC2: Linear + bias, stored at the real d_out width.
    o_ref[...] = (jnp.dot(x2, w2_ref[...], preferred_element_type=jnp.float32)
                  + b2_ref[...]).astype(o_ref.dtype)


def _round_up(n, m):
    return ((n + m - 1) // m) * m


def _pad2(a, rows, cols, dtype):
    out = jnp.zeros((rows, cols), dtype)
    return out.at[: a.shape[0], : a.shape[1]].set(a.astype(dtype))


def prepare_params(params):
    """One-time weight prep (outside the forward path): zero-pad the hidden
    dim to a 128-lane multiple and cast MXU operands to bf16.  Input/output
    feature dims (d_in / d_out) are left at their real widths."""
    d_in, h = params["w1"].shape
    d_out = params["w2"].shape[1]
    h_p = _round_up(h, 128)
    return {
        "w1": _pad2(params["w1"], d_in, h_p, jnp.bfloat16),   # (d_in, h_p)
        "b1": _pad2(params["b1"], 1, h_p, jnp.float32),       # (1, h_p)
        "wa": _pad2(params["wa"], h_p, h_p, jnp.bfloat16),    # (h_p, h_p)
        "wb": _pad2(params["wb"], h_p, h_p, jnp.bfloat16),    # (h_p, h_p)
        "w2": _pad2(params["w2"], h_p, d_out, jnp.bfloat16),  # (h_p, d_out)
        "b2": _pad2(params["b2"], 1, d_out, jnp.float32),     # (1, d_out)
    }


@functools.partial(jax.jit, static_argnames=("bn",))
def res_block_forward(x, pp, bn=None):
    """Fused Res_Block forward.  x: (N, d_in) f32; pp: prepare_params() output."""
    N, d_in = x.shape
    h_p = pp["wa"].shape[0]
    d_out = pp["w2"].shape[1]

    # Batch rows padded only to the sublane multiple (8), never to bn.
    n_p = _round_up(N, 8)
    if bn is None:
        # Biggest tile <= 512 rows that still yields >= 4 grid steps
        # (>= 2 pipeline steps per v7x TensorCore) when N allows it.
        bn = min(512, _round_up(pl.cdiv(n_p, 4), 8))
    bn = max(8, _round_up(min(bn, n_p), 8))
    grid = pl.cdiv(n_p, bn)

    x_p = x if n_p == N else jnp.pad(x, ((0, n_p - N), (0, 0)))

    # Constant index_map + single buffer => each weight/bias is DMA'd once
    # and stays resident in VMEM across the whole batch grid.
    def const(shape):
        return pl.BlockSpec(shape, lambda i: (0, 0), pipeline_mode=pl.Buffered(1))

    mm_terms = d_in * h_p + 2 * h_p * h_p + h_p * d_out
    cost = pl.CostEstimate(
        flops=2 * n_p * mm_terms,
        transcendentals=0,
        bytes_accessed=(n_p * d_in * 4 + n_p * d_out * 4     # x in, out
                        + mm_terms * 2                        # bf16 weights
                        + (h_p + d_out) * 4),                 # f32 biases
    )

    out = pl.pallas_call(
        res_block_kernel,
        out_shape=jax.ShapeDtypeStruct((n_p, d_out), jnp.float32),
        grid_spec=pltpu.PrefetchScalarGridSpec(
            num_scalar_prefetch=0,
            grid=(grid,),
            in_specs=[
                pl.BlockSpec((bn, d_in), lambda i: (i, 0)),   # x tile (unpadded)
                const((d_in, h_p)),                           # W1
                const((1, h_p)),                              # b1
                const((h_p, h_p)),                            # Wa (res j=0)
                const((h_p, h_p)),                            # Wb (res j=1)
                const((h_p, d_out)),                          # W2 (unpadded cols)
                const((1, d_out)),                            # b2
            ],
            out_specs=pl.BlockSpec((bn, d_out), lambda i: (i, 0)),
        ),
        compiler_params=pltpu.CompilerParams(
            dimension_semantics=("parallel",)),
        cost_estimate=cost,
    )(x_p, pp["w1"], pp["b1"], pp["wa"], pp["wb"], pp["w2"], pp["b2"])

    return out if n_p == N else out[:N]


def res_block_ref(x, p):
    """Pure-JAX f32 reference of Res_Block.forward, cfg=[d_in,h,h,d_out], 'RL'."""
    x1 = x @ p["w1"] + p["b1"]
    m = jnp.maximum(x1 @ p["wa"], 0.0) @ p["wb"]
    x2 = jnp.maximum(m + x1, 0.0)
    return x2 @ p["w2"] + p["b2"]


def init_params(key, d_in, h, d_out):
    ks = jax.random.split(key, 6)
    scale = 0.1
    return {
        # stored pre-transposed: (in_features, out_features)
        "w1": scale * jax.random.normal(ks[0], (d_in, h), jnp.float32),
        "b1": scale * jax.random.normal(ks[1], (1, h), jnp.float32),
        "wa": scale * jax.random.normal(ks[2], (h, h), jnp.float32),
        "wb": scale * jax.random.normal(ks[3], (h, h), jnp.float32),
        "w2": scale * jax.random.normal(ks[4], (h, d_out), jnp.float32),
        "b2": scale * jax.random.normal(ks[5], (1, d_out), jnp.float32),
    }


if __name__ == "__main__":
    # cfg = [16, 32, 32, 16], nl_type='RL'.  N=1024 -> bn=256 -> 4-step batch
    # grid (>= 2 pipeline steps per v7x TensorCore), ~1 MiB VMEM per step.
    d_in, h, d_out = 16, 32, 16
    N = 1024

    key = jax.random.PRNGKey(0)
    kx, kp = jax.random.split(key)
    x = jax.random.normal(kx, (N, d_in), jnp.float32)
    params = init_params(kp, d_in, h, d_out)

    prepped = prepare_params(params)          # one-time pad/cast, out of the hot path
    out = jax.block_until_ready(res_block_forward(x, prepped))

    ref = res_block_ref(x, params)
    assert out.shape == (N, d_out)
    # bf16 MXU operands with f32 accumulation: relaxed tolerance vs f32 ref.
    assert jnp.allclose(out, ref, atol=3e-2, rtol=3e-2), "mismatch vs reference"

    print("KERNEL_OK")
</pallas_src>

<mosaic_0001>
module attributes {stable_mosaic.version = 11 : i64} {
  func.func @res_block_kernel(%arg0: i32, %arg1: memref<256x16xf32, #tpu.memory_space<vmem>>, %arg2: memref<16x128xbf16, #tpu.memory_space<vmem>>, %arg3: memref<1x128xf32, #tpu.memory_space<vmem>>, %arg4: memref<128x128xbf16, #tpu.memory_space<vmem>>, %arg5: memref<128x128xbf16, #tpu.memory_space<vmem>>, %arg6: memref<128x16xbf16, #tpu.memory_space<vmem>>, %arg7: memref<1x16xf32, #tpu.memory_space<vmem>>, %arg8: memref<256x16xf32, #tpu.memory_space<vmem>>) attributes {dimension_semantics = [#tpu.dimension_semantics<parallel>], iteration_bounds = array<i64: 4>, scalar_prefetch = 0 : i64, scratch_operands = 0 : i64, tpu.core_type = #tpu.core_type<tc>, window_params = [{transform_indices = @transform_0, window_bounds = array<i64: 256, 16>}, {pipeline_mode = #tpu.pipeline_mode<synchronous>, transform_indices = @transform_1, window_bounds = array<i64: 16, 128>}, {pipeline_mode = #tpu.pipeline_mode<synchronous>, transform_indices = @transform_2, window_bounds = array<i64: 1, 128>}, {pipeline_mode = #tpu.pipeline_mode<synchronous>, transform_indices = @transform_3, window_bounds = array<i64: 128, 128>}, {pipeline_mode = #tpu.pipeline_mode<synchronous>, transform_indices = @transform_4, window_bounds = array<i64: 128, 128>}, {pipeline_mode = #tpu.pipeline_mode<synchronous>, transform_indices = @transform_5, window_bounds = array<i64: 128, 16>}, {pipeline_mode = #tpu.pipeline_mode<synchronous>, transform_indices = @transform_6, window_bounds = array<i64: 1, 16>}, {transform_indices = @transform_7, window_bounds = array<i64: 256, 16>}]} {
    %c0 = arith.constant 0 : index
    %c0_0 = arith.constant 0 : index
    %0 = vector.load %arg1[%c0, %c0_0] : memref<256x16xf32, #tpu.memory_space<vmem>>, vector<256x16xf32>
    %1 = arith.truncf %0 : vector<256x16xf32> to vector<256x16xbf16>
    %c0_1 = arith.constant 0 : index
    %c0_2 = arith.constant 0 : index
    %2 = vector.load %arg2[%c0_1, %c0_2] : memref<16x128xbf16, #tpu.memory_space<vmem>>, vector<16x128xbf16>
    %cst = arith.constant dense<0.000000e+00> : vector<256x128xf32>
    %3 = tpu.matmul %1, %2, %cst {dimension_numbers = #tpu.dot_dimension_numbers<[1], [0], [0], [1], [0, 0, 1, 1], [], []>} : vector<256x16xbf16>, vector<16x128xbf16>, vector<256x128xf32> -> vector<256x128xf32>
    %c0_3 = arith.constant 0 : index
    %c0_4 = arith.constant 0 : index
    %4 = vector.load %arg3[%c0_3, %c0_4] : memref<1x128xf32, #tpu.memory_space<vmem>>, vector<1x128xf32>
    %5 = vector.broadcast %4 : vector<1x128xf32> to vector<256x128xf32>
    %6 = arith.addf %3, %5 : vector<256x128xf32>
    %7 = arith.truncf %6 : vector<256x128xf32> to vector<256x128xbf16>
    %c0_5 = arith.constant 0 : index
    %c0_6 = arith.constant 0 : index
    %8 = vector.load %arg4[%c0_5, %c0_6] : memref<128x128xbf16, #tpu.memory_space<vmem>>, vector<128x128xbf16>
    %cst_7 = arith.constant dense<0.000000e+00> : vector<256x128xf32>
    %9 = tpu.matmul %7, %8, %cst_7 {dimension_numbers = #tpu.dot_dimension_numbers<[1], [0], [0], [1], [0, 0, 1, 1], [], []>} : vector<256x128xbf16>, vector<128x128xbf16>, vector<256x128xf32> -> vector<256x128xf32>
    %cst_8 = arith.constant 0.000000e+00 : f32
    %10 = vector.broadcast %cst_8 : f32 to vector<256x128xf32>
    %11 = arith.maximumf %9, %10 : vector<256x128xf32>
    %12 = arith.truncf %11 : vector<256x128xf32> to vector<256x128xbf16>
    %c0_9 = arith.constant 0 : index
    %c0_10 = arith.constant 0 : index
    %13 = vector.load %arg5[%c0_9, %c0_10] : memref<128x128xbf16, #tpu.memory_space<vmem>>, vector<128x128xbf16>
    %cst_11 = arith.constant dense<0.000000e+00> : vector<256x128xf32>
    %14 = tpu.matmul %12, %13, %cst_11 {dimension_numbers = #tpu.dot_dimension_numbers<[1], [0], [0], [1], [0, 0, 1, 1], [], []>} : vector<256x128xbf16>, vector<128x128xbf16>, vector<256x128xf32> -> vector<256x128xf32>
    %15 = arith.addf %14, %6 : vector<256x128xf32>
    %cst_12 = arith.constant 0.000000e+00 : f32
    %16 = vector.broadcast %cst_12 : f32 to vector<256x128xf32>
    %17 = arith.maximumf %15, %16 : vector<256x128xf32>
    %18 = arith.truncf %17 : vector<256x128xf32> to vector<256x128xbf16>
    %c0_13 = arith.constant 0 : index
    %c0_14 = arith.constant 0 : index
    %19 = vector.load %arg6[%c0_13, %c0_14] : memref<128x16xbf16, #tpu.memory_space<vmem>>, vector<128x16xbf16>
    %cst_15 = arith.constant dense<0.000000e+00> : vector<256x16xf32>
    %20 = tpu.matmul %18, %19, %cst_15 {dimension_numbers = #tpu.dot_dimension_numbers<[1], [0], [0], [1], [0, 0, 1, 1], [], []>} : vector<256x128xbf16>, vector<128x16xbf16>, vector<256x16xf32> -> vector<256x16xf32>
    %c0_16 = arith.constant 0 : index
    %c0_17 = arith.constant 0 : index
    %21 = vector.load %arg7[%c0_16, %c0_17] : memref<1x16xf32, #tpu.memory_space<vmem>>, vector<1x16xf32>
    %22 = vector.broadcast %21 : vector<1x16xf32> to vector<256x16xf32>
    %23 = arith.addf %20, %22 : vector<256x16xf32>
    %c0_18 = arith.constant 0 : index
    %c0_19 = arith.constant 0 : index
    %24 = vector.load %arg8[%c0_18, %c0_19] : memref<256x16xf32, #tpu.memory_space<vmem>>, vector<256x16xf32>
    tpu.vector_store %arg8[%c0_18, %c0_19], %23 {strides = array<i32>} : memref<256x16xf32, #tpu.memory_space<vmem>>, vector<256x16xf32>,
    return
  }
  func.func @transform_0(%arg0: i32) -> (i32, i32) {
    %c0_i32 = arith.constant 0 : i32
    %c0_i32_0 = arith.constant 0 : i32
    return %arg0, %c0_i32 : i32, i32
  }
  func.func @transform_1(%arg0: i32) -> (i32, i32) {
    %c0_i32 = arith.constant 0 : i32
    %c0_i32_0 = arith.constant 0 : i32
    %c0_i32_1 = arith.constant 0 : i32
    return %c0_i32, %c0_i32_0 : i32, i32
  }
  func.func @transform_2(%arg0: i32) -> (i32, i32) {
    %c0_i32 = arith.constant 0 : i32
    %c0_i32_0 = arith.constant 0 : i32
    %c0_i32_1 = arith.constant 0 : i32
    return %c0_i32, %c0_i32_0 : i32, i32
  }
  func.func @transform_3(%arg0: i32) -> (i32, i32) {
    %c0_i32 = arith.constant 0 : i32
    %c0_i32_0 = arith.constant 0 : i32
    %c0_i32_1 = arith.constant 0 : i32
    return %c0_i32, %c0_i32_0 : i32, i32
  }
  func.func @transform_4(%arg0: i32) -> (i32, i32) {
    %c0_i32 = arith.constant 0 : i32
    %c0_i32_0 = arith.constant 0 : i32
    %c0_i32_1 = arith.constant 0 : i32
    return %c0_i32, %c0_i32_0 : i32, i32
  }
  func.func @transform_5(%arg0: i32) -> (i32, i32) {
    %c0_i32 = arith.constant 0 : i32
    %c0_i32_0 = arith.constant 0 : i32
    %c0_i32_1 = arith.constant 0 : i32
    return %c0_i32, %c0_i32_0 : i32, i32
  }
  func.func @transform_6(%arg0: i32) -> (i32, i32) {
    %c0_i32 = arith.constant 0 : i32
    %c0_i32_0 = arith.constant 0 : i32
    %c0_i32_1 = arith.constant 0 : i32
    return %c0_i32, %c0_i32_0 : i32, i32
  }
  func.func @transform_7(%arg0: i32) -> (i32, i32) {
    %c0_i32 = arith.constant 0 : i32
    %c0_i32_0 = arith.constant 0 : i32
    return %arg0, %c0_i32 : i32, i32
  }
}

</mosaic_0001>

<bundles_post_ra>
// kernel: res_block_forward.1
= control target key start
LH: loop header
LB: loop body
LE: loop exit
PB: predicated region body
PF: predicated region fallthrough
CT: control target
= control target key end

     0   :  { %s1856_s24 = smov 0   ;;  %s2273_s0 = inlined_call_operand.vmem [shape: f32[1024,16], index: 0, kind: input, shape index: {}]   ;;  %s2274_s1 = inlined_call_operand.vmem [shape: bf16[16,128], index: 1, kind: input, shape index: {}]   ;;  %s2275_s2 = inlined_call_operand.vmem [shape: f32[1,128], index: 2, kind: input, shape index: {}]   ;;  %s2276_s3 = inlined_call_operand.vmem [shape: bf16[128,128], index: 3, kind: input, shape index: {}]   ;;  %s2277_s4 = inlined_call_operand.vmem [shape: bf16[128,128], index: 4, kind: input, shape index: {}]   ;;  %s2278_s5 = inlined_call_operand.vmem [shape: bf16[128,16], index: 5, kind: input, shape index: {}]   ;;  %s2279_s6 = inlined_call_operand.vmem [shape: f32[1,16], index: 6, kind: input, shape index: {}]   ;;  %s2280_s7 = inlined_call_operand.vmem [shape: f32[1024,16], index: 7, kind: output, shape index: {}]  }
   0x1 LB: > { %s1438_s25 = sadd.s32 4294967295, %s1814_s24   ;;  %p1442_p0 = scmp.ge.s32.totalorder %s1814_s24, 1  ;;  %s1814_s24 = sphi %s1856_s24, %s17_s24  }
   0x2   : > { %p238_p1 = scmp.lt.s32.totalorder %s1814_s24, 5 }
   0x4   : > { %p239_p2 = pnand %p1442_p0, %p238_p1 }
   0x5   : > { %v1783_v0 = vld [vmem:[%s2274_s1] sm:$0xff] (!%p239_p2)   ;;  %s1443_s28 = sshll.u32 (!%p239_p2), %s1438_s25, 5  ;;  %v1785_v2 = vld [vmem:[%s2276_s3 + $0x8] sm:$0xff] (!%p239_p2)   ;;  %v1786_v3 = vld [vmem:[%s2276_s3 + $0x10] sm:$0xff] (!%p239_p2)   ;;  %vm346_vm0 = vcmask (!%p239_p2), 130048  }
   0x6   : > { %242 = sbr.rel (%p239_p2) target bundleno = 956 (0x3bc), region = 48  ;;  %p271_p3 = scmp.lt.s32.totalorder (!%p239_p2), %s1443_s28, 127  ;;  %1581 = vmatprep.subr.bf16.mxu0 (!%p239_p2), %v1783_v0  ;;  %v1784_v1 = vld [vmem:[%s2276_s3] sm:$0xff] (!%p239_p2)   ;;  %v1787_v13 = vld [vmem:[%s2276_s3 + $0x18] sm:$0xff] (!%p239_p2)   ;;  %v1789_v21 = vld [vmem:[%s2276_s3 + $0x28] sm:$0xff] (!%p239_p2)  }
   0x7   : > { %1582 = vmatpush3.bf16.msra.mxu0 (!%p239_p2), %v1783_v0  ;;  %1615 = vmatprep.subr.bf16.mxu1 (!%p239_p2), %v1784_v1  ;;  %v1788_v18 = vld [vmem:[%s2276_s3 + $0x20] sm:$0xff] (!%p239_p2)   ;;  %v1790_v55 = vld [vmem:[%s2276_s3 + $0x30] sm:$0xff] (!%p239_p2)   ;;  %v1791_v56 = vld [vmem:[%s2276_s3 + $0x38] sm:$0xff] (!%p239_p2)  }
   0x8   : > { %1616 = vmatpush3.bf16.msra.mxu1 (!%p239_p2), %v1784_v1  ;;  %v1792_v57 = vld [vmem:[%s2277_s4] sm:$0xff] (!%p239_p2)   ;;  %v1793_v58 = vld [vmem:[%s2277_s4 + $0x8] sm:$0xff] (!%p239_p2)   ;;  %v1794_v59 = vld [vmem:[%s2277_s4 + $0x10] sm:$0xff] (!%p239_p2)  }
   0x9   : > { %1617 = vmatprep.subr.bf16.mxu1 (!%p239_p2), %v1785_v2  ;;  %1663 = vmatprep.subr.bf16.mxu0 (!%p239_p2), %v1792_v57  ;;  %v1795_v60 = vld [vmem:[%s2277_s4 + $0x18] sm:$0xff] (!%p239_p2)   ;;  %v1796_v61 = vld [vmem:[%s2277_s4 + $0x20] sm:$0xff] (!%p239_p2)   ;;  %v1797_v62 = vld [vmem:[%s2277_s4 + $0x28] sm:$0xff] (!%p239_p2)  }
   0xa   : > { %v1798_v63 = vld [vmem:[%s2277_s4 + $0x30] sm:$0xff] (!%p239_p2)   ;;  %v1973_v1 = vld [vmem:[%s2275_s2] ss:$0 sm:$0xff] (!%p239_p2) }
   0xc   : > { %1618 = vmatpush3.bf16.msra.mxu1 (!%p239_p2), %v1785_v2 }
   0xd   : > { %s2282_s28 = smov (!%p271_p3, %s1443_s28), 127  ;;  %1619 = vmatprep.subr.bf16.mxu1 %v1786_v3 }
   0xe   : > { %s1444_s10 = sshll.u32 %s2282_s28, 3 }
   0xf   : > { %s1881_s13 = scalar_lea.vmem %s2273_s0, %s1444_s10  ;;  %s2172_s25 = scalar_lea.vmem %s2280_s7, %s1444_s10 }
  0x10   : > { %v283_v4 = vld [vmem:[%s1881_s13] sm:$0xff]  ;;  %v284_v5 = vld [vmem:[%s1881_s13 + $0x8] sm:$0xff]  ;;  %v285_v6 = vld [vmem:[%s1881_s13 + $0x10] sm:$0xff]  ;;  %1620 = vmatpush3.bf16.msra.mxu1 %v1786_v3 }
  0x11   : > { %v315_v7 = vpack.c.bf16 %v284_v5, %v283_v4  ;;  %v286_v8 = vld [vmem:[%s1881_s13 + $0x18] sm:$0xff]  ;;  %v287_v9 = vld [vmem:[%s1881_s13 + $0x20] sm:$0xff]  ;;  %v288_v10 = vld [vmem:[%s1881_s13 + $0x28] sm:$0xff]  ;;  %1621 = vmatprep.subr.bf16.mxu1 %v1787_v13 }
  0x12   : > { %v316_v11 = vpack.c.bf16 %v286_v8, %v285_v6  ;;  %v317_v12 = vpack.c.bf16 %v288_v10, %v287_v9  ;;  %v289_v14 = vld [vmem:[%s1881_s13 + $0x30] sm:$0xff]  ;;  %v290_v15 = vld [vmem:[%s1881_s13 + $0x38] sm:$0xff]  ;;  %v291_v16 = vld [vmem:[%s1881_s13 + $0x40] sm:$0xff] }
  0x13   : > { %1583 = vmatprep.mubr.msk.bf16.mxu0 %vm346_vm0, %v315_v7  ;;  %v292_v17 = vld [vmem:[%s1881_s13 + $0x48] sm:$0xff]  ;;  %v318_v19 = vpack.c.bf16 %v290_v15, %v289_v14  ;;  %v293_v22 = vld [vmem:[%s1881_s13 + $0x50] sm:$0xff]  ;;  %v294_v23 = vld [vmem:[%s1881_s13 + $0x58] sm:$0xff] }
  0x14   : > { %1584 = vmatmul.mubr.msk.bf16.vlgmr.msra.gmra.mrb[0].mxu0 %vm346_vm0, %v316_v11  ;;  %v319_v20 = vpack.c.bf16 %v292_v17, %v291_v16  ;;  %1622 = vmatpush3.bf16.msra.mxu1 %v1787_v13  ;;  %v295_v24 = vld [vmem:[%s1881_s13 + $0x60] sm:$0xff]  ;;  %v296_v25 = vld [vmem:[%s1881_s13 + $0x68] sm:$0xff]  ;;  %v320_v26 = vpack.c.bf16 %v294_v23, %v293_v22  ;;  %v297_v28 = vld [vmem:[%s1881_s13 + $0x70] sm:$0xff] }
  0x15   : > { %1587 = vmatprep.mubr.msk.bf16.mxu0 %vm346_vm0, %v317_v12  ;;  %1623 = vmatprep.subr.bf16.mxu1 %v1788_v18  ;;  %v321_v27 = vpack.c.bf16 %v296_v25, %v295_v24  ;;  %v298_v29 = vld [vmem:[%s1881_s13 + $0x78] sm:$0xff]  ;;  %v299_v30 = vld [vmem:[%s1881_s13 + $0x80] sm:$0xff]  ;;  %v300_v31 = vld [vmem:[%s1881_s13 + $0x88] sm:$0xff] }
  0x16   : > { %v322_v32 = vpack.c.bf16 %v298_v29, %v297_v28  ;;  %v323_v33 = vpack.c.bf16 %v300_v31, %v299_v30  ;;  %v301_v34 = vld [vmem:[%s1881_s13 + $0x90] sm:$0xff]  ;;  %v302_v35 = vld [vmem:[%s1881_s13 + $0x98] sm:$0xff]  ;;  %v303_v36 = vld [vmem:[%s1881_s13 + $0xa0] sm:$0xff]  ;;  %1664 = vmatpush3.bf16.msra.mxu0 %v1792_v57 }
  0x17   : > { %v304_v37 = vld [vmem:[%s1881_s13 + $0xa8] sm:$0xff]  ;;  %v324_v38 = vpack.c.bf16 %v302_v35, %v301_v34  ;;  %v305_v40 = vld [vmem:[%s1881_s13 + $0xb0] sm:$0xff]  ;;  %v306_v41 = vld [vmem:[%s1881_s13 + $0xb8] sm:$0xff]  ;;  %1665 = vmatprep.subr.bf16.mxu0 %v1793_v58 }
  0x18   : > { %1624 = vmatpush3.bf16.msra.mxu1 %v1788_v18  ;;  %v325_v39 = vpack.c.bf16 %v304_v37, %v303_v36  ;;  %v307_v42 = vld [vmem:[%s1881_s13 + $0xc0] sm:$0xff]  ;;  %v308_v43 = vld [vmem:[%s1881_s13 + $0xc8] sm:$0xff]  ;;  %v326_v44 = vpack.c.bf16 %v306_v41, %v305_v40  ;;  %v309_v46 = vld [vmem:[%s1881_s13 + $0xd0] sm:$0xff] }
  0x19   : > { %1625 = vmatprep.subr.bf16.mxu1 %v1789_v21  ;;  %v327_v45 = vpack.c.bf16 %v308_v43, %v307_v42  ;;  %v310_v47 = vld [vmem:[%s1881_s13 + $0xd8] sm:$0xff]  ;;  %v311_v48 = vld [vmem:[%s1881_s13 + $0xe0] sm:$0xff]  ;;  %v312_v49 = vld [vmem:[%s1881_s13 + $0xe8] sm:$0xff] }
  0x1a   : > { %v328_v50 = vpack.c.bf16 %v310_v47, %v309_v46  ;;  %v329_v51 = vpack.c.bf16 %v312_v49, %v311_v48  ;;  %v313_v52 = vld [vmem:[%s1881_s13 + $0xf0] sm:$0xff]  ;;  %v314_v53 = vld [vmem:[%s1881_s13 + $0xf8] sm:$0xff]  ;;  %1666 = vmatpush3.bf16.msra.mxu0 %v1793_v58 }
  0x1b   : > { %v330_v54 = vpack.c.bf16 %v314_v53, %v313_v52  ;;  %1667 = vmatprep.subr.bf16.mxu0 %v1794_v59 }
  0x1c   : > { %1588 = vmatmul.mubr.msk.bf16.gmra.mrb[4].mxu0 %vm346_vm0, %v318_v19  ;;  %1626 = vmatpush3.bf16.msra.mxu1 %v1789_v21 }
  0x1d   : > { %1591 = vmatprep.mubr.msk.bf16.mxu0 %vm346_vm0, %v319_v20  ;;  %1627 = vmatprep.subr.bf16.mxu1 %v1790_v55 }
  0x1e   : > { %1668 = vmatpush3.bf16.msra.mxu0 %v1794_v59 }
  0x1f   : > { %1669 = vmatprep.subr.bf16.mxu0 %v1795_v60 }
  0x20   : > { %1628 = vmatpush3.bf16.msra.mxu1 %v1790_v55 }
  0x21   : > { %1629 = vmatprep.subr.bf16.mxu1 %v1791_v56 }
  0x22   : > { %1670 = vmatpush3.bf16.msra.mxu0 %v1795_v60 }
  0x23   : > { %1671 = vmatprep.subr.bf16.mxu0 %v1796_v61 }
  0x24   : > { %1592 = vmatmul.mubr.msk.bf16.gmra.mrb[8].mxu0 %vm346_vm0, %v320_v26  ;;  %1630 = vmatpush3.bf16.msra.mxu1 %v1791_v56 }
  0x25   : > { %1595 = vmatprep.mubr.msk.bf16.mxu0 %vm346_vm0, %v321_v27 }
  0x26   : > { %1672 = vmatpush3.bf16.msra.mxu0 %v1796_v61 }
  0x27   : > { %1673 = vmatprep.subr.bf16.mxu0 %v1797_v62 }
  0x2a   : > { %1674 = vmatpush3.bf16.msra.mxu0 %v1797_v62 }
  0x2b   : > { %1675 = vmatprep.subr.bf16.mxu0 %v1798_v63 }
  0x2c   : > { %1596 = vmatmul.mubr.msk.bf16.gmra.mrb[12].mxu0 %vm346_vm0, %v322_v32 }
  0x2d   : > { %1599 = vmatprep.mubr.msk.bf16.mxu0 %vm346_vm0, %v323_v33 }
  0x2e   : > { %1676 = vmatpush3.bf16.msra.mxu0 %v1798_v63 }
  0x34   : > { %1600 = vmatmul.mubr.msk.bf16.gmra.mrb[16].mxu0 %vm346_vm0, %v324_v38 }
  0x35   : > { %1603 = vmatprep.mubr.msk.bf16.mxu0 %vm346_vm0, %v325_v39 }
  0x3c   : > { %1604 = vmatmul.mubr.msk.bf16.gmra.mrb[20].mxu0 %vm346_vm0, %v326_v44 }
  0x3d   : > { %1607 = vmatprep.mubr.msk.bf16.mxu0 %vm346_vm0, %v327_v45 }
  0x44   : > { %1608 = vmatmul.mubr.msk.bf16.gmra.mrb[24].mxu0 %vm346_vm0, %v328_v50 }
  0x45   : > { %1611 = vmatprep.mubr.msk.bf16.mxu0 %vm346_vm0, %v329_v51 }
  0x4c   : > { %1612 = vmatmul.mubr.msk.bf16.gmra.mrb[28].mxu0 %vm346_vm0, %v330_v54 }
  0xe7   : > { %v1585_v0 = vpop.f32.mrb[0].mxu0 }
  0xe8   : > { %v429_v2 = vpop.f32.mrb[1].mxu0  ;;  %v1985_v8 = vadd.f32 %v1585_v0, %v1973_v1 }
  0xe9   : > { %v1586_v3 = vpop.f32.mrb[2].mxu0  ;;  %v1979_v6 = vadd.f32 %v1973_v1, %v429_v2 }
  0xea   : > { %v1976_v4 = vadd.f32 %v1586_v3, %v1973_v1  ;;  %v432_v5 = vpop.f32.mrb[3].mxu0 }
  0xeb   : > { %v1982_v7 = vadd.f32 %v1973_v1, %v432_v5 }
  0xec   : > { %v557_v10 = vpack.c.bf16 %v1976_v4, %v1985_v8 }
  0xed   : > { %v556_v9 = vpack.c.bf16 %v1982_v7, %v1979_v6 }
  0xef   : > { %v1589_v11 = vpop.f32.mrb[4].mxu0  ;;  %1631 = vmatprep.mubr.bf16.mxu1 %v556_v9 }
  0xf0   : > { %v445_v12 = vpop.f32.mrb[5].mxu0  ;;  %1632 = vmatmul.mubr.bf16.vlgmr.msra.gmra.mrb[0].mxu1 %v557_v10  ;;  %v2001_v18 = vadd.f32 %v1589_v11, %v1973_v1 }
  0xf1   : > { %v1590_v13 = vpop.f32.mrb[6].mxu0  ;;  %v1995_v16 = vadd.f32 %v1973_v1, %v445_v12 }
  0xf2   : > { %v1992_v14 = vadd.f32 %v1590_v13, %v1973_v1  ;;  %v448_v15 = vpop.f32.mrb[7].mxu0 }
  0xf3   : > { %v1998_v17 = vadd.f32 %v1973_v1, %v448_v15 }
  0xf4   : > { %v559_v20 = vpack.c.bf16 %v1992_v14, %v2001_v18 }
  0xf5   : > { %v558_v19 = vpack.c.bf16 %v1998_v17, %v1995_v16 }
  0xf7   : > { %v1593_v21 = vpop.f32.mrb[8].mxu0  ;;  %1635 = vmatprep.mubr.bf16.mxu1 %v558_v19 }
  0xf8   : > { %v461_v22 = vpop.f32.mrb[9].mxu0  ;;  %1636 = vmatmul.mubr.bf16.gmra.mrb[4].mxu1 %v559_v20  ;;  %v2017_v28 = vadd.f32 %v1593_v21, %v1973_v1 }
  0xf9   : > { %v1594_v23 = vpop.f32.mrb[10].mxu0  ;;  %v2011_v26 = vadd.f32 %v1973_v1, %v461_v22 }
  0xfa   : > { %v2008_v24 = vadd.f32 %v1594_v23, %v1973_v1  ;;  %v464_v25 = vpop.f32.mrb[11].mxu0 }
  0xfb   : > { %v2014_v27 = vadd.f32 %v1973_v1, %v464_v25 }
  0xfc   : > { %v561_v30 = vpack.c.bf16 %v2008_v24, %v2017_v28 }
  0xfd   : > { %v560_v29 = vpack.c.bf16 %v2014_v27, %v2011_v26 }
  0xff   : > { %v1597_v31 = vpop.f32.mrb[12].mxu0  ;;  %1639 = vmatprep.mubr.bf16.mxu1 %v560_v29 }
 0x100   : > { %v477_v32 = vpop.f32.mrb[13].mxu0  ;;  %1640 = vmatmul.mubr.bf16.gmra.mrb[8].mxu1 %v561_v30  ;;  %v2033_v38 = vadd.f32 %v1597_v31, %v1973_v1  ;;  %v1799_v30 = vld [vmem:[%s2277_s4 + $0x38] sm:$0xff]   ;;  %v1800_v31 = vld [vmem:[%s2278_s5] sm:$0xff]  }
 0x101   : > { %v1598_v33 = vpop.f32.mrb[14].mxu0  ;;  %v2027_v36 = vadd.f32 %v1973_v1, %v477_v32  ;;  %1677 = vmatprep.subr.bf16.mxu0 %v1799_v30  ;;  %1759 = vmatprep.subr.bf16.mxu1 %v1800_v31  ;;  %v1802_v32 = vld [vmem:[%s2278_s5 + $0x10] sm:$0xff]  }
 0x102   : > { %v2024_v34 = vadd.f32 %v1598_v33, %v1973_v1  ;;  %v480_v35 = vpop.f32.mrb[15].mxu0  ;;  %1678 = vmatpush3.bf16.msra.mxu0 %v1799_v30  ;;  %1767 = vmatpush3.bf16.msra.mxu1 %v1800_v31  ;;  %v1803_v33 = vld [vmem:[%s2278_s5 + $0x18] sm:$0xff]  }
 0x103   : > { %v2030_v37 = vadd.f32 %v1973_v1, %v480_v35  ;;  %1711 = vmatprep.subr.bf16.mxu0 %v1800_v31  ;;  %v1804_v35 = vld [vmem:[%s2278_s5 + $0x20] sm:$0xff]  }
 0x104   : > { %v563_v40 = vpack.c.bf16 %v2024_v34, %v2033_v38 }
 0x105   : > { %v562_v39 = vpack.c.bf16 %v2030_v37, %v2027_v36 }
 0x107   : > { %v1601_v41 = vpop.f32.mrb[16].mxu0  ;;  %1643 = vmatprep.mubr.bf16.mxu1 %v562_v39  ;;  %v1805_v39 = vld [vmem:[%s2278_s5 + $0x28] sm:$0xff]  }
 0x108   : > { %v493_v42 = vpop.f32.mrb[17].mxu0  ;;  %1644 = vmatmul.mubr.bf16.gmra.mrb[12].mxu1 %v563_v40  ;;  %v2049_v48 = vadd.f32 %v1601_v41, %v1973_v1 }
 0x109   : > { %v1602_v43 = vpop.f32.mrb[18].mxu0  ;;  %v2043_v46 = vadd.f32 %v1973_v1, %v493_v42 }
 0x10a   : > { %v2040_v44 = vadd.f32 %v1602_v43, %v1973_v1  ;;  %v496_v45 = vpop.f32.mrb[19].mxu0 }
 0x10b   : > { %v2046_v47 = vadd.f32 %v1973_v1, %v496_v45 }
 0x10c   : > { %v565_v50 = vpack.c.bf16 %v2040_v44, %v2049_v48 }
 0x10d   : > { %v564_v49 = vpack.c.bf16 %v2046_v47, %v2043_v46 }
 0x10f   : > { %v1605_v51 = vpop.f32.mrb[20].mxu0  ;;  %1647 = vmatprep.mubr.bf16.mxu1 %v564_v49 }
 0x110   : > { %v509_v52 = vpop.f32.mrb[21].mxu0  ;;  %1648 = vmatmul.mubr.bf16.gmra.mrb[16].mxu1 %v565_v50  ;;  %v2065_v58 = vadd.f32 %v1605_v51, %v1973_v1 }
 0x111   : > { %v1606_v53 = vpop.f32.mrb[22].mxu0  ;;  %v2059_v56 = vadd.f32 %v1973_v1, %v509_v52 }
 0x112   : > { %v2056_v54 = vadd.f32 %v1606_v53, %v1973_v1  ;;  %v512_v55 = vpop.f32.mrb[23].mxu0 }
 0x113   : > { %v2062_v57 = vadd.f32 %v1973_v1, %v512_v55 }
 0x114   : > { %v567_v60 = vpack.c.bf16 %v2056_v54, %v2065_v58 }
 0x115   : > { %v566_v59 = vpack.c.bf16 %v2062_v57, %v2059_v56 }
 0x117   : > { %v1609_v61 = vpop.f32.mrb[24].mxu0  ;;  %1651 = vmatprep.mubr.bf16.mxu1 %v566_v59 }
 0x118   : > { %v525_v62 = vpop.f32.mrb[25].mxu0  ;;  %1652 = vmatmul.mubr.bf16.gmra.mrb[20].mxu1 %v567_v60  ;;  %v2081_v9 = vadd.f32 %v1609_v61, %v1973_v1 }
 0x119   : > { %v1610_v63 = vpop.f32.mrb[26].mxu0  ;;  %v2075_v3 = vadd.f32 %v1973_v1, %v525_v62 }
 0x11a   : > { %v2072_v0 = vadd.f32 %v1610_v63, %v1973_v1  ;;  %v528_v2 = vpop.f32.mrb[27].mxu0 }
 0x11b   : > { %v2078_v5 = vadd.f32 %v1973_v1, %v528_v2 }
 0x11c   : > { %v569_v11 = vpack.c.bf16 %v2072_v0, %v2081_v9 }
 0x11d   : > { %v568_v10 = vpack.c.bf16 %v2078_v5, %v2075_v3 }
 0x11f   : > { %v1613_v12 = vpop.f32.mrb[28].mxu0  ;;  %1655 = vmatprep.mubr.bf16.mxu1 %v568_v10 }
 0x120   : > { %v541_v13 = vpop.f32.mrb[29].mxu0  ;;  %1656 = vmatmul.mubr.bf16.gmra.mrb[24].mxu1 %v569_v11  ;;  %v2097_v23 = vadd.f32 %v1613_v12, %v1973_v1 }
 0x121   : > { %v1614_v15 = vpop.f32.mrb[30].mxu0  ;;  %v2091_v21 = vadd.f32 %v1973_v1, %v541_v13 }
 0x122   : > { %v2088_v19 = vadd.f32 %v1614_v15, %v1973_v1  ;;  %v544_v20 = vpop.f32.mrb[31].mxu0 }
 0x123   : > { %v2094_v22 = vadd.f32 %v1973_v1, %v544_v20  ;;  %v1801_v1 = vld [vmem:[%s2278_s5 + $0x8] sm:$0xff]  }
 0x124   : > { %v571_v29 = vpack.c.bf16 %v2088_v19, %v2097_v23  ;;  %1760 = vmatprep.subr.bf16.mxu1 %v1801_v1 }
 0x125   : > { %v570_v25 = vpack.c.bf16 %v2094_v22, %v2091_v21  ;;  %1768 = vmatpush3.bf16.msra.mxu1 %v1801_v1 }
 0x126   : > { %1761 = vmatprep.subr.bf16.mxu1 %v1802_v32 }
 0x127   : > { %1659 = vmatprep.mubr.bf16.mxu1 %v570_v25 }
 0x128   : > { %1660 = vmatmul.mubr.bf16.gmra.mrb[28].mxu1 %v571_v29 }
 0x129   : > { %1769 = vmatpush3.bf16.msra.mxu1 %v1802_v32 }
 0x12a   : > { %1762 = vmatprep.subr.bf16.mxu1 %v1803_v33 }
 0x12d   : > { %1770 = vmatpush3.bf16.msra.mxu1 %v1803_v33 }
 0x12e   : > { %1763 = vmatprep.subr.bf16.mxu1 %v1804_v35 }
 0x131   : > { %1771 = vmatpush3.bf16.msra.mxu1 %v1804_v35 }
 0x132   : > { %1764 = vmatprep.subr.bf16.mxu1 %v1805_v39 }
 0x135   : > { %1772 = vmatpush3.bf16.msra.mxu1 %v1805_v39 }
 0x1c3   : > { %v1633_v40 = vpop.f32.mrb[0].mxu1 }
 0x1c4   : > { %v670_v41 = vpop.f32.mrb[1].mxu1  ;;  %v799_v43 = vmax.f32 %v1633_v40, 0.0 }
 0x1c5   : > { %v1634_v42 = vpop.f32.mrb[2].mxu1  ;;  %v797_v50 = vmax.f32 %v670_v41, 0.0 }
 0x1c6   : > { %v800_v45 = vmax.f32 %v1634_v42, 0.0  ;;  %v673_v49 = vpop.f32.mrb[3].mxu1 }
 0x1c7   : > { %v798_v51 = vmax.f32 %v673_v49, 0.0 }
 0x1c8   : > { %v830_v52 = vpack.c.bf16 %v800_v45, %v799_v43 }
 0x1c9   : > { %v829_v53 = vpack.c.bf16 %v798_v51, %v797_v50 }
 0x1cb   : > { %v1637_v55 = vpop.f32.mrb[4].mxu1  ;;  %1679 = vmatprep.mubr.bf16.mxu0 %v829_v53 }
 0x1cc   : > { %v686_v59 = vpop.f32.mrb[5].mxu1  ;;  %1680 = vmatmul.mubr.bf16.vlgmr.msra.gmra.mrb[32].mxu0 %v830_v52  ;;  %v803_v61 = vmax.f32 %v1637_v55, 0.0 }
 0x1cd   : > { %v1638_v60 = vpop.f32.mrb[6].mxu1  ;;  %1712 = vmatpush3.bf16.msra.mxu0 %v1800_v31  ;;  %v801_v2 = vmax.f32 %v686_v59, 0.0 }
 0x1ce   : > { %v804_v62 = vmax.f32 %v1638_v60, 0.0  ;;  %v689_v63 = vpop.f32.mrb[7].mxu1  ;;  %1713 = vmatprep.subr.bf16.mxu0 %v1801_v1 }
 0x1cf   : > { %v802_v10 = vmax.f32 %v689_v63, 0.0 }
 0x1d0   : > { %v832_v11 = vpack.c.bf16 %v804_v62, %v803_v61 }
 0x1d1   : > { %v831_v12 = vpack.c.bf16 %v802_v10, %v801_v2  ;;  %1714 = vmatpush3.bf16.msra.mxu0 %v1801_v1 }
 0x1d2   : > { %1715 = vmatprep.subr.bf16.mxu0 %v1802_v32 }
 0x1d3   : > { %v1641_v13 = vpop.f32.mrb[8].mxu1  ;;  %1683 = vmatprep.mubr.bf16.mxu0 %v831_v12 }
 0x1d4   : > { %v702_v15 = vpop.f32.mrb[9].mxu1  ;;  %1684 = vmatmul.mubr.bf16.gmra.mrb[36].mxu0 %v832_v11  ;;  %v807_v25 = vmax.f32 %v1641_v13, 0.0 }
 0x1d5   : > { %v1642_v20 = vpop.f32.mrb[10].mxu1  ;;  %1716 = vmatpush3.bf16.msra.mxu0 %v1802_v32  ;;  %v805_v31 = vmax.f32 %v702_v15, 0.0 }
 0x1d6   : > { %v808_v29 = vmax.f32 %v1642_v20, 0.0  ;;  %v705_v30 = vpop.f32.mrb[11].mxu1  ;;  %1717 = vmatprep.subr.bf16.mxu0 %v1803_v33 }
 0x1d7   : > { %v806_v40 = vmax.f32 %v705_v30, 0.0 }
 0x1d8   : > { %v834_v41 = vpack.c.bf16 %v808_v29, %v807_v25 }
 0x1d9   : > { %v833_v42 = vpack.c.bf16 %v806_v40, %v805_v31  ;;  %1718 = vmatpush3.bf16.msra.mxu0 %v1803_v33 }
 0x1da   : > { %1719 = vmatprep.subr.bf16.mxu0 %v1804_v35 }
 0x1db   : > { %v1645_v43 = vpop.f32.mrb[12].mxu1  ;;  %1687 = vmatprep.mubr.bf16.mxu0 %v833_v42 }
 0x1dc   : > { %v718_v1 = vpop.f32.mrb[13].mxu1  ;;  %1688 = vmatmul.mubr.bf16.gmra.mrb[40].mxu0 %v834_v41  ;;  %v811_v49 = vmax.f32 %v1645_v43, 0.0 }
 0x1dd   : > { %v1646_v45 = vpop.f32.mrb[14].mxu1  ;;  %1720 = vmatpush3.bf16.msra.mxu0 %v1804_v35  ;;  %v809_v32 = vmax.f32 %v718_v1, 0.0 }
 0x1de   : > { %v812_v50 = vmax.f32 %v1646_v45, 0.0  ;;  %v721_v51 = vpop.f32.mrb[15].mxu1  ;;  %1721 = vmatprep.subr.bf16.mxu0 %v1805_v39 }
 0x1df   : > { %v810_v52 = vmax.f32 %v721_v51, 0.0 }
 0x1e0   : > { %v836_v53 = vpack.c.bf16 %v812_v50, %v811_v49 }
 0x1e1   : > { %v835_v55 = vpack.c.bf16 %v810_v52, %v809_v32  ;;  %1722 = vmatpush3.bf16.msra.mxu0 %v1805_v39 }
 0x1e3   : > { %v1649_v59 = vpop.f32.mrb[16].mxu1  ;;  %1691 = vmatprep.mubr.bf16.mxu0 %v835_v55 }
 0x1e4   : > { %v734_v60 = vpop.f32.mrb[17].mxu1  ;;  %1692 = vmatmul.mubr.bf16.gmra.mrb[44].mxu0 %v836_v53  ;;  %v815_v61 = vmax.f32 %v1649_v59, 0.0 }
 0x1e5   : > { %v1650_v33 = vpop.f32.mrb[18].mxu1  ;;  %v813_v2 = vmax.f32 %v734_v60, 0.0 }
 0x1e6   : > { %v816_v62 = vmax.f32 %v1650_v33, 0.0  ;;  %v737_v63 = vpop.f32.mrb[19].mxu1 }
 0x1e7   : > { %v814_v10 = vmax.f32 %v737_v63, 0.0 }
 0x1e8   : > { %v838_v35 = vpack.c.bf16 %v816_v62, %v815_v61 }
 0x1e9   : > { %v837_v11 = vpack.c.bf16 %v814_v10, %v813_v2 }
 0x1eb   : > { %v1653_v12 = vpop.f32.mrb[20].mxu1  ;;  %1695 = vmatprep.mubr.bf16.mxu0 %v837_v11  ;;  %v1807_v11 = vld [vmem:[%s2278_s5 + $0x38] sm:$0xff]  }
 0x1ec   : > { %v750_v13 = vpop.f32.mrb[21].mxu1  ;;  %1696 = vmatmul.mubr.bf16.gmra.mrb[48].mxu0 %v838_v35  ;;  %v819_v20 = vmax.f32 %v1653_v12, 0.0  ;;  %v1806_v35 = vld [vmem:[%s2278_s5 + $0x30] sm:$0xff]  }
 0x1ed   : > { %v1654_v15 = vpop.f32.mrb[22].mxu1  ;;  %v817_v29 = vmax.f32 %v750_v13, 0.0  ;;  %1765 = vmatprep.subr.bf16.mxu1 %v1806_v35  ;;  %1723 = vmatprep.subr.bf16.mxu0 %v1806_v35 }
 0x1ee   : > { %v820_v25 = vmax.f32 %v1654_v15, 0.0  ;;  %v753_v39 = vpop.f32.mrb[23].mxu1  ;;  %1773 = vmatpush3.bf16.msra.mxu1 %v1806_v35  ;;  %1724 = vmatpush3.bf16.msra.mxu0 %v1806_v35 }
 0x1ef   : > { %v818_v30 = vmax.f32 %v753_v39, 0.0  ;;  %1725 = vmatprep.subr.bf16.mxu0 %v1807_v11  ;;  %1766 = vmatprep.subr.bf16.mxu1 %v1807_v11 }
 0x1f0   : > { %v840_v31 = vpack.c.bf16 %v820_v25, %v819_v20 }
 0x1f1   : > { %v839_v40 = vpack.c.bf16 %v818_v30, %v817_v29 }
 0x1f2   : > { %1726 = vmatpush3.bf16.msra.mxu0 %v1807_v11  ;;  %1774 = vmatpush3.bf16.msra.mxu1 %v1807_v11 }
 0x1f3   : > { %v1657_v41 = vpop.f32.mrb[24].mxu1  ;;  %1699 = vmatprep.mubr.bf16.mxu0 %v839_v40 }
 0x1f4   : > { %v766_v42 = vpop.f32.mrb[25].mxu1  ;;  %1700 = vmatmul.mubr.bf16.gmra.mrb[52].mxu0 %v840_v31  ;;  %v823_v1 = vmax.f32 %v1657_v41, 0.0 }
 0x1f5   : > { %v1658_v43 = vpop.f32.mrb[26].mxu1  ;;  %v821_v50 = vmax.f32 %v766_v42, 0.0 }
 0x1f6   : > { %v824_v45 = vmax.f32 %v1658_v43, 0.0  ;;  %v769_v49 = vpop.f32.mrb[27].mxu1 }
 0x1f7   : > { %v822_v51 = vmax.f32 %v769_v49, 0.0 }
 0x1f8   : > { %v842_v32 = vpack.c.bf16 %v824_v45, %v823_v1 }
 0x1f9   : > { %v841_v52 = vpack.c.bf16 %v822_v51, %v821_v50 }
 0x1fb   : > { %v1661_v53 = vpop.f32.mrb[28].mxu1  ;;  %1703 = vmatprep.mubr.bf16.mxu0 %v841_v52 }
 0x1fc   : > { %v782_v55 = vpop.f32.mrb[29].mxu1  ;;  %1704 = vmatmul.mubr.bf16.gmra.mrb[56].mxu0 %v842_v32  ;;  %v827_v60 = vmax.f32 %v1661_v53, 0.0 }
 0x1fd   : > { %v1662_v59 = vpop.f32.mrb[30].mxu1  ;;  %v825_v62 = vmax.f32 %v782_v55, 0.0 }
 0x1fe   : > { %v828_v33 = vmax.f32 %v1662_v59, 0.0  ;;  %v785_v61 = vpop.f32.mrb[31].mxu1 }
 0x1ff   : > { %v826_v63 = vmax.f32 %v785_v61, 0.0 }
 0x200   : > { %v844_v2 = vpack.c.bf16 %v828_v33, %v827_v60 }
 0x201   : > { %v843_v10 = vpack.c.bf16 %v826_v63, %v825_v62 }
 0x203   : > { %1707 = vmatprep.mubr.bf16.mxu0 %v843_v10 }
 0x204   : > { %1708 = vmatmul.mubr.bf16.gmra.mrb[60].mxu0 %v844_v2 }
 0x29f   : > { %v1681_v12 = vpop.f32.mrb[32].mxu0 }
 0x2a0   : > { %v952_v13 = vadd.f32 %v1681_v12, %v1985_v8  ;;  %v943_v15 = vpop.f32.mrb[33].mxu0 }
 0x2a1   : > { %v944_v20 = vadd.f32 %v943_v15, %v1979_v6  ;;  %v1682_v25 = vpop.f32.mrb[34].mxu0 }
 0x2a2   : > { %v955_v39 = vadd.f32 %v1682_v25, %v1976_v4  ;;  %v946_v29 = vpop.f32.mrb[35].mxu0  ;;  %v1072_v31 = vmax.f32 %v952_v13, 0.0 }
 0x2a3   : > { %v947_v30 = vadd.f32 %v946_v29, %v1982_v7  ;;  %v1070_v41 = vmax.f32 %v944_v20, 0.0 }
 0x2a4   : > { %v1073_v40 = vmax.f32 %v955_v39, 0.0 }
 0x2a5   : > { %v1071_v42 = vmax.f32 %v947_v30, 0.0 }
 0x2a6   : > { %v1103_v43 = vpack.c.bf16 %v1073_v40, %v1072_v31 }
 0x2a7   : > { %v1102_v1 = vpack.c.bf16 %v1071_v42, %v1070_v41  ;;  %v1685_v45 = vpop.f32.mrb[36].mxu0 }
 0x2a8   : > { %v968_v49 = vadd.f32 %v1685_v45, %v2001_v18  ;;  %v959_v50 = vpop.f32.mrb[37].mxu0 }
 0x2a9   : > { %v960_v8 = vadd.f32 %v959_v50, %v1995_v16  ;;  %v1686_v51 = vpop.f32.mrb[38].mxu0  ;;  %1727 = vmatprep.mubr.bf16.mxu0 %v1102_v1 }
 0x2aa   : > { %v971_v6 = vadd.f32 %v1686_v51, %v1992_v14  ;;  %v962_v4 = vpop.f32.mrb[39].mxu0  ;;  %1728 = vmatmul.mubr.bf16.vlgmr.msra.gmra.mrb[64].mxu0 %v1103_v43  ;;  %v1076_v32 = vmax.f32 %v968_v49, 0.0 }
 0x2ab   : > { %v963_v7 = vadd.f32 %v962_v4, %v1998_v17  ;;  %v1074_v53 = vmax.f32 %v960_v8, 0.0 }
 0x2ac   : > { %v1077_v52 = vmax.f32 %v971_v6, 0.0 }
 0x2ad   : > { %v1075_v55 = vmax.f32 %v963_v7, 0.0 }
 0x2ae   : > { %v1105_v59 = vpack.c.bf16 %v1077_v52, %v1076_v32 }
 0x2af   : > { %v1104_v60 = vpack.c.bf16 %v1075_v55, %v1074_v53  ;;  %v1689_v33 = vpop.f32.mrb[40].mxu0 }
 0x2b0   : > { %v984_v18 = vadd.f32 %v1689_v33, %v2017_v28  ;;  %v975_v61 = vpop.f32.mrb[41].mxu0 }
 0x2b1   : > { %v976_v16 = vadd.f32 %v975_v61, %v2011_v26  ;;  %v1690_v62 = vpop.f32.mrb[42].mxu0  ;;  %1731 = vmatprep.mubr.bf16.mxu1 %v1104_v60 }
 0x2b2   : > { %v987_v14 = vadd.f32 %v1690_v62, %v2008_v24  ;;  %v978_v63 = vpop.f32.mrb[43].mxu0  ;;  %1732 = vmatmul.mubr.bf16.vlgmr.msra.gmra.mrb[32].mxu1 %v1105_v59  ;;  %v1080_v2 = vmax.f32 %v984_v18, 0.0 }
 0x2b3   : > { %v979_v17 = vadd.f32 %v978_v63, %v2014_v27  ;;  %v1078_v35 = vmax.f32 %v976_v16, 0.0 }
 0x2b4   : > { %v1081_v10 = vmax.f32 %v987_v14, 0.0 }
 0x2b5   : > { %v1079_v11 = vmax.f32 %v979_v17, 0.0 }
 0x2b6   : > { %v1107_v12 = vpack.c.bf16 %v1081_v10, %v1080_v2 }
 0x2b7   : > { %v1106_v13 = vpack.c.bf16 %v1079_v11, %v1078_v35  ;;  %v1693_v15 = vpop.f32.mrb[44].mxu0 }
 0x2b8   : > { %v1000_v28 = vadd.f32 %v1693_v15, %v2033_v38  ;;  %v991_v20 = vpop.f32.mrb[45].mxu0 }
 0x2b9   : > { %v992_v26 = vadd.f32 %v991_v20, %v2027_v36  ;;  %v1694_v25 = vpop.f32.mrb[46].mxu0  ;;  %1735 = vmatprep.mubr.bf16.mxu1 %v1106_v13 }
 0x2ba   : > { %v1003_v24 = vadd.f32 %v1694_v25, %v2024_v34  ;;  %v994_v39 = vpop.f32.mrb[47].mxu0  ;;  %1736 = vmatmul.mubr.bf16.gmra.mrb[36].mxu1 %v1107_v12  ;;  %v1084_v29 = vmax.f32 %v1000_v28, 0.0 }
 0x2bb   : > { %v995_v27 = vadd.f32 %v994_v39, %v2030_v37  ;;  %v1082_v31 = vmax.f32 %v992_v26, 0.0 }
 0x2bc   : > { %v1085_v30 = vmax.f32 %v1003_v24, 0.0 }
 0x2bd   : > { %v1083_v40 = vmax.f32 %v995_v27, 0.0 }
 0x2be   : > { %v1109_v41 = vpack.c.bf16 %v1085_v30, %v1084_v29 }
 0x2bf   : > { %v1108_v42 = vpack.c.bf16 %v1083_v40, %v1082_v31  ;;  %v1697_v43 = vpop.f32.mrb[48].mxu0 }
 0x2c0   : > { %v1016_v38 = vadd.f32 %v1697_v43, %v2049_v48  ;;  %v1007_v1 = vpop.f32.mrb[49].mxu0 }
 0x2c1   : > { %v1008_v36 = vadd.f32 %v1007_v1, %v2043_v46  ;;  %v1698_v45 = vpop.f32.mrb[50].mxu0  ;;  %1739 = vmatprep.mubr.bf16.mxu1 %v1108_v42 }
 0x2c2   : > { %v1019_v34 = vadd.f32 %v1698_v45, %v2040_v44  ;;  %v1010_v49 = vpop.f32.mrb[51].mxu0  ;;  %1740 = vmatmul.mubr.bf16.gmra.mrb[40].mxu1 %v1109_v41  ;;  %v1088_v50 = vmax.f32 %v1016_v38, 0.0 }
 0x2c3   : > { %v1011_v37 = vadd.f32 %v1010_v49, %v2046_v47  ;;  %v1086_v51 = vmax.f32 %v1008_v36, 0.0 }
 0x2c4   : > { %v1089_v8 = vmax.f32 %v1019_v34, 0.0 }
 0x2c5   : > { %v1087_v6 = vmax.f32 %v1011_v37, 0.0 }
 0x2c6   : > { %v1111_v4 = vpack.c.bf16 %v1089_v8, %v1088_v50 }
 0x2c7   : > { %v1110_v7 = vpack.c.bf16 %v1087_v6, %v1086_v51  ;;  %v1701_v32 = vpop.f32.mrb[52].mxu0 }
 0x2c8   : > { %v1032_v48 = vadd.f32 %v1701_v32, %v2065_v58  ;;  %v1023_v52 = vpop.f32.mrb[53].mxu0 }
 0x2c9   : > { %v1024_v46 = vadd.f32 %v1023_v52, %v2059_v56  ;;  %v1702_v53 = vpop.f32.mrb[54].mxu0  ;;  %1743 = vmatprep.mubr.bf16.mxu1 %v1110_v7 }
 0x2ca   : > { %v1035_v44 = vadd.f32 %v1702_v53, %v2056_v54  ;;  %v1026_v55 = vpop.f32.mrb[55].mxu0  ;;  %1744 = vmatmul.mubr.bf16.gmra.mrb[44].mxu1 %v1111_v4  ;;  %v1092_v59 = vmax.f32 %v1032_v48, 0.0 }
 0x2cb   : > { %v1027_v47 = vadd.f32 %v1026_v55, %v2062_v57  ;;  %v1090_v33 = vmax.f32 %v1024_v46, 0.0 }
 0x2cc   : > { %v1093_v60 = vmax.f32 %v1035_v44, 0.0 }
 0x2cd   : > { %v1091_v18 = vmax.f32 %v1027_v47, 0.0 }
 0x2ce   : > { %v1113_v61 = vpack.c.bf16 %v1093_v60, %v1092_v59 }
 0x2cf   : > { %v1112_v16 = vpack.c.bf16 %v1091_v18, %v1090_v33  ;;  %v1705_v62 = vpop.f32.mrb[56].mxu0 }
 0x2d0   : > { %v1048_v58 = vadd.f32 %v1705_v62, %v2081_v9  ;;  %v1039_v14 = vpop.f32.mrb[57].mxu0 }
 0x2d1   : > { %v1040_v56 = vadd.f32 %v1039_v14, %v2075_v3  ;;  %v1706_v63 = vpop.f32.mrb[58].mxu0  ;;  %1747 = vmatprep.mubr.bf16.mxu1 %v1112_v16 }
 0x2d2   : > { %v1051_v54 = vadd.f32 %v1706_v63, %v2072_v0  ;;  %v1042_v17 = vpop.f32.mrb[59].mxu0  ;;  %1748 = vmatmul.mubr.bf16.gmra.mrb[48].mxu1 %v1113_v61  ;;  %v1096_v2 = vmax.f32 %v1048_v58, 0.0 }
 0x2d3   : > { %v1043_v57 = vadd.f32 %v1042_v17, %v2078_v5  ;;  %v1094_v35 = vmax.f32 %v1040_v56, 0.0 }
 0x2d4   : > { %v1097_v10 = vmax.f32 %v1051_v54, 0.0 }
 0x2d5   : > { %v1095_v11 = vmax.f32 %v1043_v57, 0.0 }
 0x2d6   : > { %v1115_v12 = vpack.c.bf16 %v1097_v10, %v1096_v2 }
 0x2d7   : > { %v1114_v13 = vpack.c.bf16 %v1095_v11, %v1094_v35  ;;  %v1709_v15 = vpop.f32.mrb[60].mxu0 }
 0x2d8   : > { %v1064_v9 = vadd.f32 %v1709_v15, %v2097_v23  ;;  %v1055_v28 = vpop.f32.mrb[61].mxu0 }
 0x2d9   : > { %v1056_v3 = vadd.f32 %v1055_v28, %v2091_v21  ;;  %v1710_v20 = vpop.f32.mrb[62].mxu0  ;;  %1751 = vmatprep.mubr.bf16.mxu1 %v1114_v13  ;;  %v2165_v21 = vld [vmem:[%s2279_s6] ss:$0 sm:$0xff] }
 0x2da   : > { %v1067_v0 = vadd.f32 %v1710_v20, %v2088_v19  ;;  %v1058_v26 = vpop.f32.mrb[63].mxu0  ;;  %1752 = vmatmul.mubr.bf16.gmra.mrb[52].mxu1 %v1115_v12  ;;  %v1100_v25 = vmax.f32 %v1064_v9, 0.0 }
 0x2db   : > { %v1059_v5 = vadd.f32 %v1058_v26, %v2094_v22  ;;  %v1098_v39 = vmax.f32 %v1056_v3, 0.0 }
 0x2dc   : > { %v1101_v24 = vmax.f32 %v1067_v0, 0.0 }
 0x2dd   : > { %v1099_v27 = vmax.f32 %v1059_v5, 0.0 }
 0x2de   : > { %v1117_v29 = vpack.c.bf16 %v1101_v24, %v1100_v25 }
 0x2df   : > { %v1116_v30 = vpack.c.bf16 %v1099_v27, %v1098_v39 }
 0x2e1   : > { %1755 = vmatprep.mubr.bf16.mxu1 %v1116_v30 }
 0x2e2   : > { %1756 = vmatmul.mubr.bf16.gmra.mrb[56].mxu1 %v1117_v29 }
 0x37d   : > { %v1729_v19 = vpop.f32.mrb[64].mxu0 }
 0x37e   : > { %v1232_v22 = vadd.f32 %v1729_v19, %v2165_v21  ;;  %v1223_v23 = vpop.f32.mrb[65].mxu0 }
 0x37f   : > { %v1224_v31 = vadd.f32 %v2165_v21, %v1223_v23  ;;  %v1730_v40 = vpop.f32.mrb[66].mxu0 }
 0x380   : > { %1352 = vst.msk [vmem:[%s2172_s25 + $0x10] sm:$0xff] %vm346_vm0, %v1232_v22  ;;  %v1235_v41 = vadd.f32 %v1730_v40, %v2165_v21  ;;  %v1226_v42 = vpop.f32.mrb[67].mxu0 }
 0x381   : > { %1350 = vst.msk [vmem:[%s2172_s25] sm:$0xff] %vm346_vm0, %v1224_v31  ;;  %v1227_v43 = vadd.f32 %v2165_v21, %v1226_v42 }
 0x382   : > { %1353 = vst.msk [vmem:[%s2172_s25 + $0x18] sm:$0xff] %vm346_vm0, %v1235_v41 }
 0x383   : > { %1351 = vst.msk [vmem:[%s2172_s25 + $0x8] sm:$0xff] %vm346_vm0, %v1227_v43 }
 0x385   : > { %v1733_v38 = vpop.f32.mrb[32].mxu1 }
 0x386   : > { %v1248_v1 = vadd.f32 %v1733_v38, %v2165_v21  ;;  %v1239_v36 = vpop.f32.mrb[33].mxu1 }
 0x387   : > { %v1240_v45 = vadd.f32 %v2165_v21, %v1239_v36  ;;  %v1734_v34 = vpop.f32.mrb[34].mxu1 }
 0x388   : > { %1356 = vst.msk [vmem:[%s2172_s25 + $0x30] sm:$0xff] %vm346_vm0, %v1248_v1  ;;  %v1251_v49 = vadd.f32 %v1734_v34, %v2165_v21  ;;  %v1242_v37 = vpop.f32.mrb[35].mxu1 }
 0x389   : > { %1354 = vst.msk [vmem:[%s2172_s25 + $0x20] sm:$0xff] %vm346_vm0, %v1240_v45  ;;  %v1243_v50 = vadd.f32 %v2165_v21, %v1242_v37 }
 0x38a   : > { %1357 = vst.msk [vmem:[%s2172_s25 + $0x38] sm:$0xff] %vm346_vm0, %v1251_v49 }
 0x38b   : > { %1355 = vst.msk [vmem:[%s2172_s25 + $0x28] sm:$0xff] %vm346_vm0, %v1243_v50 }
 0x38d   : > { %v1737_v8 = vpop.f32.mrb[36].mxu1 }
 0x38e   : > { %v1264_v51 = vadd.f32 %v1737_v8, %v2165_v21  ;;  %v1255_v6 = vpop.f32.mrb[37].mxu1 }
 0x38f   : > { %v1256_v4 = vadd.f32 %v2165_v21, %v1255_v6  ;;  %v1738_v7 = vpop.f32.mrb[38].mxu1 }
 0x390   : > { %1360 = vst.msk [vmem:[%s2172_s25 + $0x50] sm:$0xff] %vm346_vm0, %v1264_v51  ;;  %v1267_v32 = vadd.f32 %v1738_v7, %v2165_v21  ;;  %v1258_v48 = vpop.f32.mrb[39].mxu1 }
 0x391   : > { %1358 = vst.msk [vmem:[%s2172_s25 + $0x40] sm:$0xff] %vm346_vm0, %v1256_v4  ;;  %v1259_v52 = vadd.f32 %v2165_v21, %v1258_v48 }
 0x392   : > { %1361 = vst.msk [vmem:[%s2172_s25 + $0x58] sm:$0xff] %vm346_vm0, %v1267_v32 }
 0x393   : > { %1359 = vst.msk [vmem:[%s2172_s25 + $0x48] sm:$0xff] %vm346_vm0, %v1259_v52 }
 0x395   : > { %v1741_v46 = vpop.f32.mrb[40].mxu1 }
 0x396   : > { %v1280_v53 = vadd.f32 %v1741_v46, %v2165_v21  ;;  %v1271_v44 = vpop.f32.mrb[41].mxu1 }
 0x397   : > { %v1272_v55 = vadd.f32 %v2165_v21, %v1271_v44  ;;  %v1742_v47 = vpop.f32.mrb[42].mxu1 }
 0x398   : > { %1364 = vst.msk [vmem:[%s2172_s25 + $0x70] sm:$0xff] %vm346_vm0, %v1280_v53  ;;  %v1283_v59 = vadd.f32 %v1742_v47, %v2165_v21  ;;  %v1274_v60 = vpop.f32.mrb[43].mxu1 }
 0x399   : > { %1362 = vst.msk [vmem:[%s2172_s25 + $0x60] sm:$0xff] %vm346_vm0, %v1272_v55  ;;  %v1275_v33 = vadd.f32 %v2165_v21, %v1274_v60 }
 0x39a   : > { %1365 = vst.msk [vmem:[%s2172_s25 + $0x78] sm:$0xff] %vm346_vm0, %v1283_v59 }
 0x39b   : > { %1363 = vst.msk [vmem:[%s2172_s25 + $0x68] sm:$0xff] %vm346_vm0, %v1275_v33 }
 0x39d   : > { %v1745_v18 = vpop.f32.mrb[44].mxu1 }
 0x39e   : > { %v1296_v61 = vadd.f32 %v1745_v18, %v2165_v21  ;;  %v1287_v16 = vpop.f32.mrb[45].mxu1 }
 0x39f   : > { %v1288_v62 = vadd.f32 %v2165_v21, %v1287_v16  ;;  %v1746_v58 = vpop.f32.mrb[46].mxu1 }
 0x3a0   : > { %1368 = vst.msk [vmem:[%s2172_s25 + $0x90] sm:$0xff] %vm346_vm0, %v1296_v61  ;;  %v1299_v14 = vadd.f32 %v1746_v58, %v2165_v21  ;;  %v1290_v56 = vpop.f32.mrb[47].mxu1 }
 0x3a1   : > { %1366 = vst.msk [vmem:[%s2172_s25 + $0x80] sm:$0xff] %vm346_vm0, %v1288_v62  ;;  %v1291_v63 = vadd.f32 %v2165_v21, %v1290_v56 }
 0x3a2   : > { %1369 = vst.msk [vmem:[%s2172_s25 + $0x98] sm:$0xff] %vm346_vm0, %v1299_v14 }
 0x3a3   : > { %1367 = vst.msk [vmem:[%s2172_s25 + $0x88] sm:$0xff] %vm346_vm0, %v1291_v63 }
 0x3a5   : > { %v1749_v54 = vpop.f32.mrb[48].mxu1 }
 0x3a6   : > { %v1312_v17 = vadd.f32 %v1749_v54, %v2165_v21  ;;  %v1303_v57 = vpop.f32.mrb[49].mxu1 }
 0x3a7   : > { %v1304_v2 = vadd.f32 %v2165_v21, %v1303_v57  ;;  %v1750_v10 = vpop.f32.mrb[50].mxu1 }
 0x3a8   : > { %1372 = vst.msk [vmem:[%s2172_s25 + $0xb0] sm:$0xff] %vm346_vm0, %v1312_v17  ;;  %v1315_v35 = vadd.f32 %v1750_v10, %v2165_v21  ;;  %v1306_v11 = vpop.f32.mrb[51].mxu1 }
 0x3a9   : > { %1370 = vst.msk [vmem:[%s2172_s25 + $0xa0] sm:$0xff] %vm346_vm0, %v1304_v2  ;;  %v1307_v12 = vadd.f32 %v2165_v21, %v1306_v11 }
 0x3aa   : > { %1373 = vst.msk [vmem:[%s2172_s25 + $0xb8] sm:$0xff] %vm346_vm0, %v1315_v35 }
 0x3ab   : > { %1371 = vst.msk [vmem:[%s2172_s25 + $0xa8] sm:$0xff] %vm346_vm0, %v1307_v12 }
 0x3ad   : > { %v1753_v13 = vpop.f32.mrb[52].mxu1 }
 0x3ae   : > { %v1328_v15 = vadd.f32 %v1753_v13, %v2165_v21  ;;  %v1319_v9 = vpop.f32.mrb[53].mxu1 }
 0x3af   : > { %v1320_v28 = vadd.f32 %v2165_v21, %v1319_v9  ;;  %v1754_v3 = vpop.f32.mrb[54].mxu1 }
 0x3b0   : > { %1376 = vst.msk [vmem:[%s2172_s25 + $0xd0] sm:$0xff] %vm346_vm0, %v1328_v15  ;;  %v1331_v20 = vadd.f32 %v1754_v3, %v2165_v21  ;;  %v1322_v0 = vpop.f32.mrb[55].mxu1 }
 0x3b1   : > { %1374 = vst.msk [vmem:[%s2172_s25 + $0xc0] sm:$0xff] %vm346_vm0, %v1320_v28  ;;  %v1323_v26 = vadd.f32 %v2165_v21, %v1322_v0 }
 0x3b2   : > { %1377 = vst.msk [vmem:[%s2172_s25 + $0xd8] sm:$0xff] %vm346_vm0, %v1331_v20 }
 0x3b3   : > { %1375 = vst.msk [vmem:[%s2172_s25 + $0xc8] sm:$0xff] %vm346_vm0, %v1323_v26 }
 0x3b5   : > { %v1757_v5 = vpop.f32.mrb[56].mxu1 }
 0x3b6   : > { %v1344_v25 = vadd.f32 %v1757_v5, %v2165_v21  ;;  %v1335_v24 = vpop.f32.mrb[57].mxu1 }
 0x3b7   : > { %v1336_v39 = vadd.f32 %v2165_v21, %v1335_v24  ;;  %v1758_v27 = vpop.f32.mrb[58].mxu1 }
 0x3b8   : > { %1380 = vst.msk [vmem:[%s2172_s25 + $0xf0] sm:$0xff] %vm346_vm0, %v1344_v25  ;;  %v1347_v29 = vadd.f32 %v1758_v27, %v2165_v21  ;;  %v1338_v30 = vpop.f32.mrb[59].mxu1 }
 0x3b9   : > { %1378 = vst.msk [vmem:[%s2172_s25 + $0xe0] sm:$0xff] %vm346_vm0, %v1336_v39  ;;  %v1339_v19 = vadd.f32 %v2165_v21, %v1338_v30 }
 0x3ba   : > { %1381 = vst.msk [vmem:[%s2172_s25 + $0xf8] sm:$0xff] %vm346_vm0, %v1347_v29 }
 0x3bb   : > { %1379 = vst.msk [vmem:[%s2172_s25 + $0xe8] sm:$0xff] %vm346_vm0, %v1339_v19 }
 0x3bc PF: > { %s17_s24 = sadd.s32 1, %s1814_s24  }
 0x3bd   : > { %p14_p4 = scmp.ge.s32.totalorder %s17_s24, 6  }
 0x3bf   :  { %16 = sbr.rel (!%p14_p4) target bundleno = 1 (0x1), region = 78 }

</bundles_post_ra>
